<compile_context>
chip_gen: v7x
topology: tpu7x:2x2x1
jax: 0.10.0
libtpu: 0.0.40
codegen_flags: <defaults>
</compile_context>

<pallas_src>
import jax
import jax.numpy as jnp
from jax.experimental import pallas as pl
from jax.experimental.pallas import tpu as pltpu

# Module hyperparameters (shapes implied by the PyTorch module)
NUM_BASES = 4
EMBEDDING_DIM = 8
NUM_FILTERS = 16
FILTER_SIZE = 3
ENC_IN = 32   # encoder: Linear(32, 5)
ENC_OUT = 5
DEC_OUT = 32  # decoder: Linear(5, 32)

# Default batch tile: (TM, 32) f32 = 1 MiB per input tile -> amortizes the
# ~0.35 us per-grid-step overhead while staying far under VMEM even on v7x
# with double-buffered input + both outputs.
DEFAULT_TM = 8192


def _feature_kernel(x_ref, wet_ref, be_ref, wc_ref, bc_ref, enc_ref, dec_ref):
    # x:   (TM, 32) any dtype    -> cast to f32 in-kernel
    # wet: (32, 5)   = We^T       be: (1, 5)
    # wc:  (32, 32)  = We^T @ Wd^T  bc: (1, 32) = be @ Wd^T + bd
    x = x_ref[...].astype(jnp.float32)
    enc_ref[...] = (
        jnp.dot(x, wet_ref[...], preferred_element_type=jnp.float32) + be_ref[...]
    )
    dec = jnp.dot(x, wc_ref[...], preferred_element_type=jnp.float32) + bc_ref[...]
    dec_ref[...] = jnp.clip(dec, 0.0, 4.0)


def dna_feature_extractor_forward(x, params, *, tm=DEFAULT_TM):
    """Returns (encoded, decoded) matching the PyTorch forward."""
    B = x.shape[0]
    TM = B if B <= tm else tm  # full-dim block for small B, else multiple-of-8 tile
    grid = (pl.cdiv(B, TM),)

    we = params["enc_w"].astype(jnp.float32)            # (5, 32)
    be = params["enc_b"].astype(jnp.float32)            # (5,)
    wd = params["dec_w"].astype(jnp.float32)            # (32, 5)
    bd = params["dec_b"].astype(jnp.float32)            # (32,)

    # Pre-transpose / fold affine maps on the host side (exact, both are affine):
    wet = we.T                                           # (32, 5)
    be2 = be.reshape(1, ENC_OUT)                         # (1, 5)
    wc = we.T @ wd.T                                     # (32, 32)
    bc = (be @ wd.T + bd).reshape(1, DEC_OUT)            # (1, 32)

    encoded, decoded = pl.pallas_call(
        _feature_kernel,
        out_shape=(
            jax.ShapeDtypeStruct((B, ENC_OUT), jnp.float32),
            jax.ShapeDtypeStruct((B, DEC_OUT), jnp.float32),
        ),
        grid=grid,
        in_specs=[
            pl.BlockSpec((TM, ENC_IN), lambda i: (i, 0)),        # x tile
            pl.BlockSpec((ENC_IN, ENC_OUT), lambda i: (0, 0)),   # We^T (resident)
            pl.BlockSpec((1, ENC_OUT), lambda i: (0, 0)),        # be   (resident)
            pl.BlockSpec((ENC_IN, DEC_OUT), lambda i: (0, 0)),   # Wc   (resident)
            pl.BlockSpec((1, DEC_OUT), lambda i: (0, 0)),        # bc   (resident)
        ],
        out_specs=(
            pl.BlockSpec((TM, ENC_OUT), lambda i: (i, 0)),
            pl.BlockSpec((TM, DEC_OUT), lambda i: (i, 0)),
        ),
        compiler_params=pltpu.CompilerParams(
            dimension_semantics=("parallel",),
        ),
    )(x, wet, be2, wc, bc)
    return encoded, decoded


def init_params(key):
    """Deterministic parameter init with shapes from the module __init__."""
    keys = jax.random.split(key, 8)
    params = {
        # encoder / decoder (used in forward)
        "enc_w": jax.random.normal(keys[0], (ENC_OUT, ENC_IN), jnp.float32) * 0.1,
        "enc_b": jax.random.normal(keys[1], (ENC_OUT,), jnp.float32) * 0.1,
        "dec_w": jax.random.normal(keys[2], (DEC_OUT, ENC_OUT), jnp.float32) * 0.1,
        "dec_b": jax.random.normal(keys[3], (DEC_OUT,), jnp.float32) * 0.1,
        # embedding / conv1d params exist in __init__ but are unused in forward
        "embedding": jax.random.normal(keys[4], (NUM_BASES, EMBEDDING_DIM), jnp.float32) * 0.1,
        "conv_w": jax.random.normal(keys[5], (NUM_FILTERS, EMBEDDING_DIM, FILTER_SIZE), jnp.float32) * 0.1,
        "conv_b": jax.random.normal(keys[6], (NUM_FILTERS,), jnp.float32) * 0.1,
    }
    return params


def _reference(x, params):
    xf = x.astype(jnp.float32)
    enc = xf @ params["enc_w"].T + params["enc_b"]
    dec = jnp.clip(enc @ params["dec_w"].T + params["dec_b"], 0.0, 4.0)
    return enc, dec


if __name__ == "__main__":
    key = jax.random.PRNGKey(0)
    pkey, xkey1, xkey2 = jax.random.split(key, 3)
    params = init_params(pkey)

    # Small input consistent with the forward: (batch, 32).
    B = 8
    x = jax.random.normal(xkey1, (B, ENC_IN), jnp.float32)

    encoded, decoded = dna_feature_extractor_forward(x, params)
    jax.block_until_ready((encoded, decoded))

    enc_ref, dec_ref = _reference(x, params)
    assert encoded.shape == (B, ENC_OUT) and decoded.shape == (B, DEC_OUT)
    assert jnp.allclose(encoded, enc_ref, atol=1e-5)
    assert jnp.allclose(decoded, dec_ref, atol=1e-5)

    # Also exercise the multi-tile grid path (small TM to force grid > 1).
    B2 = 64
    x2 = jax.random.normal(xkey2, (B2, ENC_IN), jnp.float32)
    enc2, dec2 = dna_feature_extractor_forward(x2, params, tm=16)
    jax.block_until_ready((enc2, dec2))
    enc2_ref, dec2_ref = _reference(x2, params)
    assert jnp.allclose(enc2, enc2_ref, atol=1e-5)
    assert jnp.allclose(dec2, dec2_ref, atol=1e-5)

    print("KERNEL_OK")
</pallas_src>

<mosaic_0001>
module attributes {stable_mosaic.version = 11 : i64} {
  func.func @_feature_kernel(%arg0: i32, %arg1: memref<8x32xf32, #tpu.memory_space<vmem>>, %arg2: memref<32x5xf32, #tpu.memory_space<vmem>>, %arg3: memref<1x5xf32, #tpu.memory_space<vmem>>, %arg4: memref<32x32xf32, #tpu.memory_space<vmem>>, %arg5: memref<1x32xf32, #tpu.memory_space<vmem>>, %arg6: memref<8x5xf32, #tpu.memory_space<vmem>>, %arg7: memref<8x32xf32, #tpu.memory_space<vmem>>) attributes {dimension_semantics = [#tpu.dimension_semantics<parallel>], iteration_bounds = array<i64: 1>, scalar_prefetch = 0 : i64, scratch_operands = 0 : i64, tpu.core_type = #tpu.core_type<tc>, window_params = [{transform_indices = @transform_0, window_bounds = array<i64: 8, 32>}, {pipeline_mode = #tpu.pipeline_mode<synchronous>, transform_indices = @transform_1, window_bounds = array<i64: 32, 5>}, {pipeline_mode = #tpu.pipeline_mode<synchronous>, transform_indices = @transform_2, window_bounds = array<i64: 1, 5>}, {pipeline_mode = #tpu.pipeline_mode<synchronous>, transform_indices = @transform_3, window_bounds = array<i64: 32, 32>}, {pipeline_mode = #tpu.pipeline_mode<synchronous>, transform_indices = @transform_4, window_bounds = array<i64: 1, 32>}, {transform_indices = @transform_5, window_bounds = array<i64: 8, 5>}, {transform_indices = @transform_6, window_bounds = array<i64: 8, 32>}]} {
    %c0 = arith.constant 0 : index
    %c0_0 = arith.constant 0 : index
    %0 = vector.load %arg1[%c0, %c0_0] : memref<8x32xf32, #tpu.memory_space<vmem>>, vector<8x32xf32>
    %c0_1 = arith.constant 0 : index
    %c0_2 = arith.constant 0 : index
    %1 = vector.load %arg2[%c0_1, %c0_2] : memref<32x5xf32, #tpu.memory_space<vmem>>, vector<32x5xf32>
    %cst = arith.constant dense<0.000000e+00> : vector<8x5xf32>
    %2 = tpu.matmul %0, %1, %cst {dimension_numbers = #tpu.dot_dimension_numbers<[1], [0], [0], [1], [0, 0, 1, 1], [], []>} : vector<8x32xf32>, vector<32x5xf32>, vector<8x5xf32> -> vector<8x5xf32>
    %c0_3 = arith.constant 0 : index
    %c0_4 = arith.constant 0 : index
    %3 = vector.load %arg3[%c0_3, %c0_4] : memref<1x5xf32, #tpu.memory_space<vmem>>, vector<1x5xf32>
    %4 = vector.broadcast %3 : vector<1x5xf32> to vector<8x5xf32>
    %5 = arith.addf %2, %4 : vector<8x5xf32>
    %c0_5 = arith.constant 0 : index
    %c0_6 = arith.constant 0 : index
    %6 = vector.load %arg6[%c0_5, %c0_6] : memref<8x5xf32, #tpu.memory_space<vmem>>, vector<8x5xf32>
    tpu.vector_store %arg6[%c0_5, %c0_6], %5 {strides = array<i32>} : memref<8x5xf32, #tpu.memory_space<vmem>>, vector<8x5xf32>,
    %c0_7 = arith.constant 0 : index
    %c0_8 = arith.constant 0 : index
    %7 = vector.load %arg4[%c0_7, %c0_8] : memref<32x32xf32, #tpu.memory_space<vmem>>, vector<32x32xf32>
    %cst_9 = arith.constant dense<0.000000e+00> : vector<8x32xf32>
    %8 = tpu.matmul %0, %7, %cst_9 {dimension_numbers = #tpu.dot_dimension_numbers<[1], [0], [0], [1], [0, 0, 1, 1], [], []>} : vector<8x32xf32>, vector<32x32xf32>, vector<8x32xf32> -> vector<8x32xf32>
    %c0_10 = arith.constant 0 : index
    %c0_11 = arith.constant 0 : index
    %9 = vector.load %arg5[%c0_10, %c0_11] : memref<1x32xf32, #tpu.memory_space<vmem>>, vector<1x32xf32>
    %10 = vector.broadcast %9 : vector<1x32xf32> to vector<8x32xf32>
    %11 = arith.addf %8, %10 : vector<8x32xf32>
    %cst_12 = arith.constant 0.000000e+00 : f32
    %cst_13 = arith.constant 4.000000e+00 : f32
    %12 = vector.broadcast %cst_12 : f32 to vector<8x32xf32>
    %13 = arith.maximumf %12, %11 : vector<8x32xf32>
    %14 = vector.broadcast %cst_13 : f32 to vector<8x32xf32>
    %15 = arith.minimumf %14, %13 : vector<8x32xf32>
    %c0_14 = arith.constant 0 : index
    %c0_15 = arith.constant 0 : index
    %16 = vector.load %arg7[%c0_14, %c0_15] : memref<8x32xf32, #tpu.memory_space<vmem>>, vector<8x32xf32>
    tpu.vector_store %arg7[%c0_14, %c0_15], %15 {strides = array<i32>} : memref<8x32xf32, #tpu.memory_space<vmem>>, vector<8x32xf32>,
    return
  }
  func.func @transform_0(%arg0: i32) -> (i32, i32) {
    %c0_i32 = arith.constant 0 : i32
    %c0_i32_0 = arith.constant 0 : i32
    return %arg0, %c0_i32 : i32, i32
  }
  func.func @transform_1(%arg0: i32) -> (i32, i32) {
    %c0_i32 = arith.constant 0 : i32
    %c0_i32_0 = arith.constant 0 : i32
    %c0_i32_1 = arith.constant 0 : i32
    return %c0_i32, %c0_i32_0 : i32, i32
  }
  func.func @transform_2(%arg0: i32) -> (i32, i32) {
    %c0_i32 = arith.constant 0 : i32
    %c0_i32_0 = arith.constant 0 : i32
    %c0_i32_1 = arith.constant 0 : i32
    return %c0_i32, %c0_i32_0 : i32, i32
  }
  func.func @transform_3(%arg0: i32) -> (i32, i32) {
    %c0_i32 = arith.constant 0 : i32
    %c0_i32_0 = arith.constant 0 : i32
    %c0_i32_1 = arith.constant 0 : i32
    return %c0_i32, %c0_i32_0 : i32, i32
  }
  func.func @transform_4(%arg0: i32) -> (i32, i32) {
    %c0_i32 = arith.constant 0 : i32
    %c0_i32_0 = arith.constant 0 : i32
    %c0_i32_1 = arith.constant 0 : i32
    return %c0_i32, %c0_i32_0 : i32, i32
  }
  func.func @transform_5(%arg0: i32) -> (i32, i32) {
    %c0_i32 = arith.constant 0 : i32
    %c0_i32_0 = arith.constant 0 : i32
    return %arg0, %c0_i32 : i32, i32
  }
  func.func @transform_6(%arg0: i32) -> (i32, i32) {
    %c0_i32 = arith.constant 0 : i32
    %c0_i32_0 = arith.constant 0 : i32
    return %arg0, %c0_i32 : i32, i32
  }
}

</mosaic_0001>

<bundles_post_ra>
// kernel: tpu_custom_call.1
= control target key start
LH: loop header
LB: loop body
LE: loop exit
PB: predicated region body
PF: predicated region fallthrough
CT: control target
= control target key end

     0   :  { %12 = vsyncpa [#allocation3], 0  ;;  %v325_v3 = vmov 0.0|0.0   ;;  %vm326_vm0 = vmmov 0   ;;  %v327_v9 = vmov 0.0   ;;  %s425_s0 = inlined_call_operand.vmem [shape: f32[8,32], index: 0, kind: input, shape index: {}]   ;;  %s426_s1 = inlined_call_operand.vmem [shape: f32[32,5], index: 1, kind: input, shape index: {}]   ;;  %s427_s2 = inlined_call_operand.vmem [shape: f32[1,5], index: 2, kind: input, shape index: {}]   ;;  %s428_s3 = inlined_call_operand.vmem [shape: f32[32,32], index: 3, kind: input, shape index: {}]   ;;  %s429_s4 = inlined_call_operand.vmem [shape: f32[1,32], index: 4, kind: input, shape index: {}]   ;;  %s430_s5 = inlined_call_operand.hbm [shape: f32[8,5], index: 5, kind: output, shape index: {0}]   ;;  %s431_s6 = inlined_call_operand.hbm [shape: f32[8,32], index: 6, kind: output, shape index: {1}]  }
   0x1   :  { %v112_v0 = vld [vmem:[%s428_s3] sm:$0xff]  ;;  %v113_v1 = vld [vmem:[%s428_s3 + $0x8] sm:$0xff]  ;;  %266 = vmatprep.subr.bf16.mxu1 %v325_v3  ;;  %260 = vmatprep.subr.bf16.mxu0 %v325_v3  ;;  %v114_v6 = vld [vmem:[%s428_s3 + $0x10] sm:$0xff] }
   0x2   :  { %v25_v2 = vld [vmem:[%s426_s1] sm:$0xff]  ;;  %v267_v4 = vpack.c.bf16 %v113_v1, %v112_v0  ;;  %v26_v5 = vld [vmem:[%s426_s1 + $0x8] sm:$0xff]  ;;  %v115_v7 = vld [vmem:[%s428_s3 + $0x18] sm:$0xff]  ;;  %257 = vmatprep.mubr.msk.f32.mxu1 %vm326_vm0, %v327_v9  ;;  %246 = vmatprep.mubr.msk.f32.mxu0 %vm326_vm0, %v327_v9 }
   0x3   :  { %v261_v8 = vpack.c.bf16 %v26_v5, %v25_v2  ;;  %v27_v10 = vld [vmem:[%s426_s1 + $0x10] sm:$0xff]  ;;  %v28_v11 = vld [vmem:[%s426_s1 + $0x18] sm:$0xff]  ;;  %v270_v12 = vpack.c.bf16 %v115_v7, %v114_v6 }
   0x4   :  { %268 = vmatpush3.bf16.msra.mxu1 %v267_v4 }
   0x5   :  { %13 = vsyncpa [#allocation5], 0  ;;  %262 = vmatpush3.bf16.msra.mxu0 %v261_v8  ;;  %269 = vmatprep.subr.bf16.mxu1 %v325_v3  ;;  %v264_v13 = vpack.c.bf16 %v28_v11, %v27_v10  ;;  %v24_v14 = vld [vmem:[%s425_s0] sm:$0xff]  ;;  %vm36_vm1 = vcmask 261120   ;;  %s328_s17 = smov [#allocation2]   ;;  %vm110_vm2 = vcmask 39936  }
   0x6   :  { %263 = vmatprep.subr.bf16.mxu0 %v325_v3  ;;  %v226_v15 = vld [vmem:[%s429_s4] ss:$0 sm:$0xff]  ;;  %s202_s18 = sshll.u32 %s328_s17, 4  ;;  %s329_s0 = smov [#allocation4]   ;;  %s203_s18 = int_to_ptr.vmem [resolvable:$true] %s202_s18 }
   0x7   :  { %v224_v16 = vld [vmem:[%s427_s2] ss:$0 sm:$0xff]  ;;  %s212_s19 = sshll.u32 %s329_s0, 4  ;;  %s277_s4 = scalar_lea.vmem %s203_s18, 128  ;;  %s213_s19 = int_to_ptr.vmem [resolvable:$true] %s212_s19 }
   0x8   :  { %271 = vmatpush3.bf16.msra.mxu1 %v270_v12  ;;  %p278_p0 = scmp.ne.s32.totalorder %s203_s18, %s277_s4  ;;  %p282_p1 = scmp.lt.s32.totalorder %s203_s18, %s203_s18 }
   0x9   :  { %265 = vmatpush3.bf16.msra.mxu0 %v264_v13  ;;  %p283_p2 = scmp.lt.s32.totalorder %s277_s4, %s277_s4 }
   0xb   :  { %258 = vmatmul.mubr.msk.f32.vlgmr.msra.gmra.mrb[0].mxu1 %vm36_vm1, %v24_v14  ;;  %p284_p3 = por %p283_p2, %p282_p1 }
   0xc   :  { %247 = vmatmul.mubr.msk.f32.vlgmr.msra.gmra.mrb[0].mxu0 %vm36_vm1, %v24_v14 }
   0xd   :  { %p285_p4 = pnand %p284_p3, %p278_p0 }
  0xde   :  { %v189_v17 = vpop.f32.mrb[0].mxu1 }
  0xdf   :  { %v190_v18 = vadd.f32 %v226_v15, %v189_v17  ;;  %v259_v19 = vpop.f32.mrb[1].mxu1  ;;  %v106_v20 = vpop.f32.mrb[0].mxu0 }
  0xe0   :  { %v107_v21 = vadd.f32 %v224_v16, %v106_v20  ;;  %v248_v22 = vpop.f32.mrb[1].mxu0 }
  0xe1   :  { %v193_v23 = vmax.f32 %v190_v18, 0.0 }
  0xe2   :  { %111 = vst.msk [vmem:[#allocation2] sm:$0xff] %vm110_vm2, %v107_v21 }
  0xe3   :  { %v194_v24 = vmin.f32 %v193_v23, 4.0 }
  0xe4   :  { %288 = shalt.err (!%p285_p4)
}
  0xe5   :  { %s289_s21 = scalar_lea.hbm %s430_s5, 128 }
  0xe6   :  { %p290_p5 = scmp.ne.s32.totalorder %s430_s5, %s289_s21  ;;  %p293_p6 = scmp.lt.u32.totalorder %s289_s21, %s430_s5 }
  0xe8   :  { %p295_p7 = pnand %p293_p6, %p290_p5 }
  0xea   :  { %298 = shalt.err (!%p295_p7)
}
  0xeb   :  { %205 = dma.vmem_to_hbm [thread:$0]  %s203_s18, 128, %s430_s5, [#allocation3]   ;;  %195 = vst.msk [vmem:[#allocation4] sm:$0xff] %vm36_vm1, %v194_v24 }
  0xec   :  { %s299_s28 = scalar_lea.vmem %s213_s19, 128  ;;  %p304_p9 = scmp.lt.s32.totalorder %s213_s19, %s213_s19 }
  0xed   :  { %p300_p8 = scmp.ne.s32.totalorder %s213_s19, %s299_s28  ;;  %p305_p10 = scmp.lt.s32.totalorder %s299_s28, %s299_s28 }
  0xef   :  { %p306_p11 = por %p305_p10, %p304_p9 }
  0xf1   :  { %p307_p12 = pnand %p306_p11, %p300_p8 }
  0xf3   :  { %310 = shalt.err (!%p307_p12)
}
  0xf4   :  { %s311_s7 = scalar_lea.hbm %s431_s6, 128 }
  0xf5   :  { %p312_p13 = scmp.ne.s32.totalorder %s431_s6, %s311_s7  ;;  %p315_p0 = scmp.lt.u32.totalorder %s311_s7, %s431_s6 }
  0xf7   :  { %p317_p1 = pnand %p315_p0, %p312_p13 }
  0xf9   :  { %320 = shalt.err (!%p317_p1)
}
  0xfa   :  { %215 = dma.vmem_to_hbm [thread:$0]  %s213_s19, 128, %s431_s6, [#allocation5]  }
  0xfb   :  { %321 = dma.done.wait [#allocation3], 128  }
  0xfc   :  { %322 = vsyncadd [#allocation3], 4294967168 }
  0xfd   :  { %323 = dma.done.wait [#allocation5], 128  }
  0xfe   :  { %324 = vsyncadd [#allocation5], 4294967168 }
  0xff   :  { %222 = vsyncpa [#allocation3], 1 }
 0x100   :  { %223 = vsyncpa [#allocation5], 1 }

</bundles_post_ra>
